<compile_context>
chip_gen: v7x
topology: tpu7x:2x2x1
jax: 0.10.0
libtpu: 0.0.40
codegen_flags: <defaults>
</compile_context>

<pallas_src>
import functools

import jax
import jax.numpy as jnp
from jax.experimental import pallas as pl
from jax.experimental.pallas import tpu as pltpu

_LANES = 128
_SUBLANES = 8
_MAX_TILE_M = 4096      # rows per block: 4096*128*4B = 2 MiB per f32 input block
_NUM_PARTS = 2          # leading "parallel" grid axis (v7x dual TensorCore)


def _l1_sum_kernel(x_ref, t_ref, out_ref, acc_ref, *,
                   tile_m, m_rows, steps_per_part, need_mask):
    p = pl.program_id(0)   # part (parallel axis)
    s = pl.program_id(1)   # step within part (arbitrary / reduction axis)

    @pl.when(s == 0)
    def _():
        acc_ref[...] = jnp.zeros_like(acc_ref)

    # Native-dtype tiles; upcast on the VPU (hidden under the HBM DMA).
    x = x_ref[...].astype(jnp.float32)
    t = t_ref[...].astype(jnp.float32)
    a = jnp.abs(x - t)

    if need_mask:
        # Zero rows past the real array end (ragged last block and/or
        # clamped duplicate blocks on the overrun steps of the last part).
        row0 = (p * steps_per_part + s) * tile_m
        rows = row0 + jax.lax.broadcasted_iota(jnp.int32, (tile_m, _LANES), 0)
        a = jnp.where(rows < m_rows, a, 0.0)

    # Partial sums stay (8, 128)-shaped: pure vreg-wise VPU adds, no per-step
    # cross-lane reduce and no scalar read-modify-write chain.
    acc_ref[...] += a.reshape(tile_m // _SUBLANES, _SUBLANES, _LANES).sum(axis=0)

    @pl.when(s == steps_per_part - 1)
    def _():
        out_ref[0, :, :] = acc_ref[...]


def l1_loss(inp, target):
    """Mean absolute error, matching torch.nn.L1Loss() (reduction='mean')."""
    assert inp.shape == target.shape, "L1Loss requires matching shapes"
    n_elems = inp.size
    out_dtype = jnp.promote_types(inp.dtype, target.dtype)

    # Flatten without changing dtype (reshape of a contiguous array is free).
    x = inp.reshape(-1)
    t = target.reshape(-1)

    # Lane-dense (m, 128) slab with m a multiple of 8. Pad the flat tail only
    # when n is not already a multiple of 8*128; padded zeros contribute 0.
    chunk = _SUBLANES * _LANES
    padded = ((n_elems + chunk - 1) // chunk) * chunk
    if padded != n_elems:
        x = jnp.pad(x, (0, padded - n_elems))
        t = jnp.pad(t, (0, padded - n_elems))

    m = padded // _LANES                      # multiple of 8
    x2 = x.reshape(m, _LANES)
    t2 = t.reshape(m, _LANES)

    tile_m = m if m <= _MAX_TILE_M else _MAX_TILE_M     # full extent or mult-of-8
    steps_total = (m + tile_m - 1) // tile_m
    num_parts = _NUM_PARTS if steps_total >= _NUM_PARTS else 1
    steps_per_part = (steps_total + num_parts - 1) // num_parts
    # Mask needed if the virtual (num_parts * steps_per_part) steps overrun m.
    need_mask = num_parts * steps_per_part * tile_m > m

    def in_map(p, s):
        step = p * steps_per_part + s
        # Clamp overrun steps of the last part to a valid block; their rows
        # are zeroed by the in-kernel mask.
        return (jnp.minimum(step, steps_total - 1), 0)

    kernel = functools.partial(
        _l1_sum_kernel,
        tile_m=tile_m, m_rows=m,
        steps_per_part=steps_per_part, need_mask=need_mask)

    partials = pl.pallas_call(
        kernel,
        out_shape=jax.ShapeDtypeStruct((num_parts, _SUBLANES, _LANES), jnp.float32),
        grid_spec=pltpu.PrefetchScalarGridSpec(
            num_scalar_prefetch=0,
            grid=(num_parts, steps_per_part),
            in_specs=[
                pl.BlockSpec((tile_m, _LANES), in_map),
                pl.BlockSpec((tile_m, _LANES), in_map),
            ],
            out_specs=pl.BlockSpec((1, _SUBLANES, _LANES), lambda p, s: (p, 0, 0)),
            scratch_shapes=[pltpu.VMEM((_SUBLANES, _LANES), jnp.float32)],
        ),
        compiler_params=pltpu.CompilerParams(
            dimension_semantics=("parallel", "arbitrary"),
        ),
    )(x2, t2)

    # Single cross-lane/sublane reduce + divide-by-N as one tiny fused XLA op.
    total = jnp.sum(partials, dtype=jnp.float32)
    return (total / jnp.float32(n_elems)).astype(out_dtype)


if __name__ == "__main__":
    key = jax.random.PRNGKey(0)
    k1, k2 = jax.random.split(key)

    # Small shapes consistent with a typical training batch.
    inp = jax.random.normal(k1, (2, 4, 16, 16), dtype=jnp.float32)
    target = jax.random.normal(k2, (2, 4, 16, 16), dtype=jnp.float32)

    loss = l1_loss(inp, target)
    jax.block_until_ready(loss)

    ref = jnp.mean(jnp.abs(inp - target))
    assert jnp.allclose(loss, ref, rtol=1e-6, atol=1e-6), (loss, ref)

    # Second case: native bf16 inputs, large enough to exercise the
    # multi-block, dual-part, masked-tail path.
    k3, k4 = jax.random.split(k2)
    a = jax.random.normal(k3, (8, 8, 96, 96), dtype=jnp.bfloat16)
    b = jax.random.normal(k4, (8, 8, 96, 96), dtype=jnp.bfloat16)
    loss2 = l1_loss(a, b)
    jax.block_until_ready(loss2)
    ref2 = jnp.mean(jnp.abs(a.astype(jnp.float32) - b.astype(jnp.float32)))
    assert jnp.allclose(loss2.astype(jnp.float32), ref2, rtol=2e-2, atol=2e-2), (loss2, ref2)

    print("KERNEL_OK")
</pallas_src>

<mosaic_0001>
module attributes {stable_mosaic.version = 11 : i64} {
  func.func @_l1_sum_kernel(%arg0: i32, %arg1: i32, %arg2: memref<16x128xf32, #tpu.memory_space<vmem>>, %arg3: memref<16x128xf32, #tpu.memory_space<vmem>>, %arg4: memref<1x8x128xf32, #tpu.memory_space<vmem>>, %arg5: memref<8x128xf32, #tpu.memory_space<vmem>>) attributes {dimension_semantics = [#tpu.dimension_semantics<parallel>, #tpu.dimension_semantics<arbitrary>], iteration_bounds = array<i64: 1, 1>, scalar_prefetch = 0 : i64, scratch_operands = 1 : i64, tpu.core_type = #tpu.core_type<tc>, window_params = [{transform_indices = @transform_0, window_bounds = array<i64: 16, 128>}, {transform_indices = @transform_1, window_bounds = array<i64: 16, 128>}, {transform_indices = @transform_2, window_bounds = array<i64: 1, 8, 128>}]} {
    %c0_i32 = arith.constant 0 : i32
    %0 = arith.cmpi eq, %arg1, %c0_i32 : i32
    %1 = arith.extui %0 : i1 to i32
    %c0_i32_0 = arith.constant 0 : i32
    %2 = arith.cmpi ne, %1, %c0_i32_0 : i32
    scf.if %2 {
      %cst_10 = arith.constant 0.000000e+00 : f32
      %15 = vector.broadcast %cst_10 : f32 to vector<8x128xf32>
      %c0_11 = arith.constant 0 : index
      %c0_12 = arith.constant 0 : index
      %16 = vector.load %arg5[%c0_11, %c0_12] : memref<8x128xf32, #tpu.memory_space<vmem>>, vector<8x128xf32>
      tpu.vector_store %arg5[%c0_11, %c0_12], %15 {strides = array<i32>} : memref<8x128xf32, #tpu.memory_space<vmem>>, vector<8x128xf32>,
    } else {
    }
    %c0 = arith.constant 0 : index
    %c0_1 = arith.constant 0 : index
    %3 = vector.load %arg2[%c0, %c0_1] : memref<16x128xf32, #tpu.memory_space<vmem>>, vector<16x128xf32>
    %c0_2 = arith.constant 0 : index
    %c0_3 = arith.constant 0 : index
    %4 = vector.load %arg3[%c0_2, %c0_3] : memref<16x128xf32, #tpu.memory_space<vmem>>, vector<16x128xf32>
    %5 = arith.subf %3, %4 : vector<16x128xf32>
    %6 = math.absf %5 : vector<16x128xf32>
    %c0_4 = arith.constant 0 : index
    %c0_5 = arith.constant 0 : index
    %7 = vector.load %arg5[%c0_4, %c0_5] : memref<8x128xf32, #tpu.memory_space<vmem>>, vector<8x128xf32>
    %8 = vector.shape_cast %6 : vector<16x128xf32> to vector<2x8x128xf32>
    %cst = arith.constant dense<0.000000e+00> : vector<8x128xf32>
    %9 = vector.multi_reduction <add>, %8, %cst [0] : vector<2x8x128xf32> to vector<8x128xf32>
    %10 = arith.addf %7, %9 : vector<8x128xf32>
    %c0_6 = arith.constant 0 : index
    %c0_7 = arith.constant 0 : index
    %11 = vector.load %arg5[%c0_6, %c0_7] : memref<8x128xf32, #tpu.memory_space<vmem>>, vector<8x128xf32>
    tpu.vector_store %arg5[%c0_6, %c0_7], %10 {strides = array<i32>} : memref<8x128xf32, #tpu.memory_space<vmem>>, vector<8x128xf32>,
    %c0_i32_8 = arith.constant 0 : i32
    %12 = arith.cmpi eq, %arg1, %c0_i32_8 : i32
    %13 = arith.extui %12 : i1 to i32
    %c0_i32_9 = arith.constant 0 : i32
    %14 = arith.cmpi ne, %13, %c0_i32_9 : i32
    scf.if %14 {
      %c0_10 = arith.constant 0 : index
      %c0_11 = arith.constant 0 : index
      %15 = vector.load %arg5[%c0_10, %c0_11] : memref<8x128xf32, #tpu.memory_space<vmem>>, vector<8x128xf32>
      %c0_12 = arith.constant 0 : index
      %c0_13 = arith.constant 0 : index
      %c0_14 = arith.constant 0 : index
      %16 = vector.load %arg4[%c0_12, %c0_13, %c0_14] : memref<1x8x128xf32, #tpu.memory_space<vmem>>, vector<1x8x128xf32>
      %17 = vector.shape_cast %16 : vector<1x8x128xf32> to vector<8x128xf32>
      %18 = vector.shape_cast %15 : vector<8x128xf32> to vector<1x8x128xf32>
      tpu.vector_store %arg4[%c0_12, %c0_13, %c0_14], %18 {strides = array<i32>} : memref<1x8x128xf32, #tpu.memory_space<vmem>>, vector<1x8x128xf32>,
    } else {
    }
    return
  }
  func.func @transform_0(%arg0: i32, %arg1: i32) -> (i32, i32) {
    %c1_i32 = arith.constant 1 : i32
    %0 = arith.muli %arg0, %c1_i32 : i32
    %1 = arith.addi %0, %arg1 : i32
    %c0_i32 = arith.constant 0 : i32
    %2 = arith.minsi %1, %c0_i32 : i32
    %c0_i32_0 = arith.constant 0 : i32
    %c0_i32_1 = arith.constant 0 : i32
    return %2, %c0_i32_0 : i32, i32
  }
  func.func @transform_1(%arg0: i32, %arg1: i32) -> (i32, i32) {
    %c1_i32 = arith.constant 1 : i32
    %0 = arith.muli %arg0, %c1_i32 : i32
    %1 = arith.addi %0, %arg1 : i32
    %c0_i32 = arith.constant 0 : i32
    %2 = arith.minsi %1, %c0_i32 : i32
    %c0_i32_0 = arith.constant 0 : i32
    %c0_i32_1 = arith.constant 0 : i32
    return %2, %c0_i32_0 : i32, i32
  }
  func.func @transform_2(%arg0: i32, %arg1: i32) -> (i32, i32, i32) {
    %c0_i32 = arith.constant 0 : i32
    %c0_i32_0 = arith.constant 0 : i32
    %c0_i32_1 = arith.constant 0 : i32
    return %arg0, %c0_i32, %c0_i32_0 : i32, i32, i32
  }
}

</mosaic_0001>

<bundles_post_ra>
// kernel: tpu_custom_call.1
= control target key start
LH: loop header
LB: loop body
LE: loop exit
PB: predicated region body
PF: predicated region fallthrough
CT: control target
= control target key end

     0   :  { %7 = vsyncpa [#allocation4], 0  ;;  %s235_s0 = inlined_call_operand.hbm [shape: f32[16,128], index: 0, kind: input, shape index: {}]   ;;  %s236_s1 = inlined_call_operand.hbm [shape: f32[16,128], index: 1, kind: input, shape index: {}]   ;;  %s237_s2 = inlined_call_operand.hbm [shape: f32[1,8,128], index: 2, kind: output, shape index: {}]  }
   0x1   :  { %8 = vsyncpa [#allocation7], 0 }
   0x2   :  { %9 = vsyncpa [#allocation5], 0  ;;  %s179_s9 = smov [#allocation3]   ;;  %s107_s13 = scalar_lea.hbm %s235_s0, 256 }
   0x3   :  { %s21_s10 = sshll.u32 %s179_s9, 4  ;;  %p108_p0 = scmp.ne.s32.totalorder %s235_s0, %s107_s13  ;;  %s22_s10 = int_to_ptr.vmem [resolvable:$true] %s21_s10 }
   0x4   :  { %p111_p1 = scmp.lt.u32.totalorder %s107_s13, %s235_s0 }
   0x6   :  { %p113_p2 = pnand %p111_p1, %p108_p0 }
   0x8   :  { %116 = shalt.err (!%p113_p2)
}
   0x9   :  { %s117_s18 = scalar_lea.vmem %s22_s10, 256  ;;  %p122_p4 = scmp.lt.s32.totalorder %s22_s10, %s22_s10 }
   0xa   :  { %p118_p3 = scmp.ne.s32.totalorder %s22_s10, %s117_s18  ;;  %p123_p5 = scmp.lt.s32.totalorder %s117_s18, %s117_s18 }
   0xc   :  { %p124_p6 = por %p123_p5, %p122_p4 }
   0xe   :  { %p125_p7 = pnand %p124_p6, %p118_p3 }
  0x10   :  { %128 = shalt.err (!%p125_p7)
}
  0x11   :  { %s180_s19 = smov 128   ;;  %s181_s20 = smov 8  }
  0x12   :  { %27 = dma.hbm_to_vmem [thread:$0]  %s235_s0, 256, %s22_s10, [#allocation4], %s180_s19, %s180_s19, %s181_s20  }
  0x13   :  { %s182_s23 = smov [#allocation6]   ;;  %s129_s27 = scalar_lea.hbm %s236_s1, 256 }
  0x14   :  { %s39_s24 = sshll.u32 %s182_s23, 4  ;;  %p130_p8 = scmp.ne.s32.totalorder %s236_s1, %s129_s27  ;;  %s40_s24 = int_to_ptr.vmem [resolvable:$true] %s39_s24 }
  0x15   :  { %p133_p9 = scmp.lt.u32.totalorder %s129_s27, %s236_s1 }
  0x17   :  { %p135_p10 = pnand %p133_p9, %p130_p8 }
  0x19   :  { %138 = shalt.err (!%p135_p10)
}
  0x1a   :  { %s139_s4 = scalar_lea.vmem %s40_s24, 256  ;;  %p144_p12 = scmp.lt.s32.totalorder %s40_s24, %s40_s24 }
  0x1b   :  { %p140_p11 = scmp.ne.s32.totalorder %s40_s24, %s139_s4  ;;  %p145_p13 = scmp.lt.s32.totalorder %s139_s4, %s139_s4 }
  0x1d   :  { %p146_p0 = por %p145_p13, %p144_p12 }
  0x1f   :  { %p147_p1 = pnand %p146_p0, %p140_p11 }
  0x21   :  { %150 = shalt.err (!%p147_p1)
}
  0x22   :  { %45 = dma.hbm_to_vmem [thread:$0]  %s236_s1, 256, %s40_s24, [#allocation7], %s180_s19, %s180_s19, %s181_s20  }
  0x23   :  { %173 = dma.done.wait [#allocation4], 256  }
  0x24   :  { %174 = vsyncadd [#allocation4], 4294967040 }
  0x25   :  { %175 = dma.done.wait [#allocation7], 256  }
  0x26   :  { %176 = vsyncadd [#allocation7], 4294967040  ;;  %v65_v0 = vld [vmem:[#allocation3] sm:$0xff]  ;;  %v66_v1 = vld [vmem:[#allocation3 + $0x8] sm:$0xff]  ;;  %s183_s6 = smov [#allocation8]  }
  0x27   :  { %v67_v2 = vld [vmem:[#allocation6] sm:$0xff]  ;;  %v68_v3 = vld [vmem:[#allocation6 + $0x8] sm:$0xff]  ;;  %s88_s7 = sshll.u32 %s183_s6, 4  ;;  %s89_s7 = int_to_ptr.vmem [resolvable:$true] %s88_s7 }
  0x28   :  { %v69_v4 = vsub.f32 %v65_v0, %v67_v2  ;;  %v70_v5 = vsub.f32 %v66_v1, %v68_v3  ;;  %s151_s8 = scalar_lea.vmem %s89_s7, 128  ;;  %p156_p3 = scmp.lt.s32.totalorder %s89_s7, %s89_s7 }
  0x29   :  { %p152_p2 = scmp.ne.s32.totalorder %s89_s7, %s151_s8  ;;  %p157_p4 = scmp.lt.s32.totalorder %s151_s8, %s151_s8 }
  0x2a   :  { %v71_v6 = vand.u32 2147483647, %v69_v4  ;;  %v72_v7 = vand.u32 2147483647, %v70_v5 }
  0x2b   :  { %p158_p5 = por %p157_p4, %p156_p3 }
  0x2c   :  { %v74_v8 = vadd.f32 %v72_v7, %v71_v6 }
  0x2d   :  { %p159_p6 = pnand %p158_p5, %p152_p2 }
  0x2e   :  { %81 = vst [vmem:[#allocation8] sm:$0xff] %v74_v8 }
  0x2f   :  { %162 = shalt.err (!%p159_p6)
}
  0x30   :  { %s163_s10 = scalar_lea.hbm %s237_s2, 128 }
  0x31   :  { %p164_p7 = scmp.ne.s32.totalorder %s237_s2, %s163_s10  ;;  %p167_p8 = scmp.lt.u32.totalorder %s163_s10, %s237_s2 }
  0x33   :  { %p169_p9 = pnand %p167_p8, %p164_p7 }
  0x35   :  { %172 = shalt.err (!%p169_p9)
}
  0x36   :  { %91 = dma.vmem_to_hbm [thread:$0]  %s89_s7, 128, %s237_s2, [#allocation5]  }
  0x37   :  { %177 = dma.done.wait [#allocation5], 128  }
  0x38   :  { %178 = vsyncadd [#allocation5], 4294967168 }
  0x39   :  { %95 = vsyncpa [#allocation4], 1 }
  0x3a   :  { %96 = vsyncpa [#allocation7], 1 }
  0x3b   :  { %97 = vsyncpa [#allocation5], 1 }

</bundles_post_ra>
